<compile_context>
chip_gen: v5e
topology: v5e:2x2
jax: 0.10.0
libtpu: 0.0.40
codegen_flags: <defaults>
</compile_context>

<pallas_src>
import jax
import jax.numpy as jnp
from jax.experimental import pallas as pl
from jax.experimental.pallas import tpu as pltpu


# ----------------------------- kernels --------------------------------------


def _ffn_kernel_acc_in_out(x_ref, w1_ref, b1_ref, w2_ref, b2_ref, o_ref):
    """f32 output: accumulate the hidden-axis reduction directly in the
    resident output tile (index_map (i,0) for every h) — no scratch needed."""
    h_idx = pl.program_id(1)

    # First matmul restricted to this hidden slice (bf16 operands, f32 acc);
    # bias + ReLU in f32.  ReLU is elementwise over H, so per-tile is exact.
    a = jnp.dot(x_ref[...], w1_ref[...], preferred_element_type=jnp.float32)
    a = jnp.maximum(a + b1_ref[...], 0.0)

    # Intentional downcast of the activation to the compute dtype (bf16) for
    # the second MXU matmul; accumulation stays f32.
    partial = jnp.dot(a.astype(w2_ref.dtype), w2_ref[...],
                      preferred_element_type=jnp.float32)

    @pl.when(h_idx == 0)
    def _():
        o_ref[...] = partial          # first slice: plain store (no zero-fill)

    @pl.when(h_idx > 0)
    def _():
        o_ref[...] += partial

    @pl.when(h_idx == pl.num_programs(1) - 1)
    def _():
        o_ref[...] += b2_ref[...]     # b2 added exactly once per row tile


def _ffn_kernel_scratch(x_ref, w1_ref, b1_ref, w2_ref, b2_ref, o_ref, acc_ref):
    """Low-precision output dtype: keep an f32 VMEM accumulator and cast on
    the final hidden step."""
    h_idx = pl.program_id(1)

    a = jnp.dot(x_ref[...], w1_ref[...], preferred_element_type=jnp.float32)
    a = jnp.maximum(a + b1_ref[...], 0.0)
    partial = jnp.dot(a.astype(w2_ref.dtype), w2_ref[...],
                      preferred_element_type=jnp.float32)

    @pl.when(h_idx == 0)
    def _():
        acc_ref[...] = partial

    @pl.when(h_idx > 0)
    def _():
        acc_ref[...] += partial

    @pl.when(h_idx == pl.num_programs(1) - 1)
    def _():
        o_ref[...] = (acc_ref[...] + b2_ref[...]).astype(o_ref.dtype)


# ----------------------------- wrapper ---------------------------------------


def _round_up(x, m):
    return (x + m - 1) // m * m


def _tpu_config():
    """Returns (per-core VMEM bytes, MXU-friendly padding quantum, two-TC?)."""
    vmem_cap = 64 * 1024 * 1024           # conservative fallback (v7x per-TC)
    try:
        vmem_cap = int(pltpu.get_tpu_info().vmem_capacity_bytes)
    except Exception:
        pass
    quantum, two_tc = 128, False
    try:
        kind = jax.devices()[0].device_kind.lower()
        if "v7" in kind:
            quantum, two_tc = 256, True   # 2x256x256 MXU, 2 TCs/chip
        elif "v6" in kind:
            quantum, two_tc = 256, False  # 2x256x256 MXU
        # v5e and older: 128 quantum (4x128^2 MXU), single TC
    except Exception:
        pass
    return vmem_cap, quantum, two_tc


def _vmem_estimate(tm, th, d_pad, cbytes, obytes, use_scratch):
    """Dtype-aware working-set estimate: double-buffered inputs/output plus
    (optional) single-buffered f32 accumulator; biases counted with their
    8-sublane padding."""
    x_t = tm * d_pad * cbytes
    w1_t = d_pad * th * cbytes
    w2_t = th * d_pad * cbytes
    b1_t = 8 * th * 4
    b2_t = 8 * d_pad * 4
    o_t = tm * d_pad * obytes
    acc_t = tm * d_pad * 4 if use_scratch else 0
    return 2 * (x_t + w1_t + b1_t + w2_t + b2_t + o_t) + acc_t


def position_wise_ffn(x, w1, b1, w2, b2, *, tile_rows=512, tile_hidden=512,
                      compute_dtype=jnp.bfloat16):
    """x: (batch, seq, model_dim). w1: (D, H), b1: (H,), w2: (H, D), b2: (D,)."""
    batch, seq, model_dim = x.shape
    hidden_dim = w1.shape[1]
    assert w1.shape == (model_dim, hidden_dim)
    assert b1.shape == (hidden_dim,)
    assert w2.shape == (hidden_dim, model_dim)
    assert b2.shape == (model_dim,)

    out_dtype = x.dtype
    rows = batch * seq

    vmem_cap, quantum, two_tc = _tpu_config()

    # Lane-dense / MXU-aligned padded sizes and initial tile choices.
    d_pad = _round_up(model_dim, quantum)
    th = min(_round_up(tile_hidden, 128), _round_up(hidden_dim, quantum))
    tm = min(_round_up(tile_rows, 8), _round_up(rows, 8))

    use_scratch = (out_dtype != jnp.float32)
    cbytes = jnp.dtype(compute_dtype).itemsize
    obytes = jnp.dtype(out_dtype).itemsize

    # Fit tiles to the real per-core VMEM budget (leave headroom for the
    # compiler's internal scratch): shrink the hidden tile first, then rows.
    budget = int(vmem_cap * 0.8)
    while _vmem_estimate(tm, th, d_pad, cbytes, obytes, use_scratch) > budget and th > 128:
        th = max(128, th // 2)
    while _vmem_estimate(tm, th, d_pad, cbytes, obytes, use_scratch) > budget and tm > 8:
        tm = max(8, _round_up(tm // 2, 8))

    # v7x: keep >= 2 row tiles (when rows permit without crippling the MXU)
    # so the "parallel" row axis can shard across both TensorCores.
    if two_tc and rows >= 256:
        tm = min(tm, max(128, _round_up((rows + 1) // 2, 8)))

    # Pad hidden up to a multiple of TH (zero-padded units contribute nothing)
    # instead of forcing TH to divide it; pad rows to a multiple of TM.
    h_pad = _round_up(hidden_dim, th)
    rows_pad = _round_up(rows, tm)

    est = _vmem_estimate(tm, th, d_pad, cbytes, obytes, use_scratch)
    vmem_limit = int(min(max(int(est * 1.25), 32 * 1024 * 1024),
                         int(vmem_cap * 0.9)))

    # Zero-pad: padded x columns hit zero W1 rows; padded hidden units have
    # zero W1 cols / b1 / W2 rows so they contribute nothing; padded output
    # columns / rows are sliced off below.  Matmul operands go to bf16;
    # biases stay f32.
    x2d = jnp.pad(x.reshape(rows, model_dim).astype(compute_dtype),
                  ((0, rows_pad - rows), (0, d_pad - model_dim)))
    w1p = jnp.pad(w1.astype(compute_dtype),
                  ((0, d_pad - model_dim), (0, h_pad - hidden_dim)))
    w2p = jnp.pad(w2.astype(compute_dtype),
                  ((0, h_pad - hidden_dim), (0, d_pad - model_dim)))
    b1p = jnp.pad(b1.astype(jnp.float32), (0, h_pad - hidden_dim)).reshape(1, h_pad)
    b2p = jnp.pad(b2.astype(jnp.float32), (0, d_pad - model_dim)).reshape(1, d_pad)

    grid = (rows_pad // tm, h_pad // th)

    kernel = _ffn_kernel_scratch if use_scratch else _ffn_kernel_acc_in_out
    scratch = ([pltpu.VMEM((tm, d_pad), jnp.float32)] if use_scratch else [])

    out2d = pl.pallas_call(
        kernel,
        out_shape=jax.ShapeDtypeStruct((rows_pad, d_pad), out_dtype),
        grid=grid,
        in_specs=[
            pl.BlockSpec((tm, d_pad), lambda i, h: (i, 0)),   # x row tile
            pl.BlockSpec((d_pad, th), lambda i, h: (0, h)),   # W1 hidden slice
            pl.BlockSpec((1, th),     lambda i, h: (0, h)),   # b1 hidden slice
            pl.BlockSpec((th, d_pad), lambda i, h: (h, 0)),   # W2 hidden slice
            pl.BlockSpec((1, d_pad),  lambda i, h: (0, 0)),   # b2 (invariant)
        ],
        out_specs=pl.BlockSpec((tm, d_pad), lambda i, h: (i, 0)),
        scratch_shapes=scratch,
        compiler_params=pltpu.CompilerParams(
            dimension_semantics=("parallel", "arbitrary"),
            vmem_limit_bytes=vmem_limit),
    )(x2d, w1p, b1p, w2p, b2p)

    return out2d[:rows, :model_dim].reshape(batch, seq, model_dim)


# ----------------------------- reference & test ------------------------------


def reference_ffn(x, w1, b1, w2, b2, compute_dtype=jnp.float32):
    """Same math with the same operand-dtype policy (for apples-to-apples)."""
    h = jnp.dot(x.astype(compute_dtype), w1.astype(compute_dtype),
                preferred_element_type=jnp.float32)
    h = jnp.maximum(h + b1.astype(jnp.float32), 0.0)
    out = jnp.dot(h.astype(compute_dtype), w2.astype(compute_dtype),
                  preferred_element_type=jnp.float32)
    return (out + b2.astype(jnp.float32)).astype(x.dtype)


def _make_params(key, model_dim, hidden_dim):
    kw1, kb1, kw2, kb2 = jax.random.split(key, 4)
    lim1 = 1.0 / (model_dim ** 0.5)
    lim2 = 1.0 / (hidden_dim ** 0.5)
    w1 = jax.random.uniform(kw1, (model_dim, hidden_dim), jnp.float32, -lim1, lim1)
    b1 = jax.random.uniform(kb1, (hidden_dim,), jnp.float32, -lim1, lim1)
    w2 = jax.random.uniform(kw2, (hidden_dim, model_dim), jnp.float32, -lim2, lim2)
    b2 = jax.random.uniform(kb2, (model_dim,), jnp.float32, -lim2, lim2)
    return w1, b1, w2, b2


def _check(x, w1, b1, w2, b2, atol_f32):
    out = jax.block_until_ready(position_wise_ffn(x, w1, b1, w2, b2))
    assert out.shape == x.shape and out.dtype == x.dtype
    # Tight check against a reference with the same bf16-operand policy.
    ref_bf16 = reference_ffn(x, w1, b1, w2, b2, compute_dtype=jnp.bfloat16)
    assert jnp.allclose(out, ref_bf16, atol=1e-3, rtol=1e-2), "mismatch vs bf16 ref"
    # Loose sanity check against the exact f32 reference.
    ref_f32 = reference_ffn(x, w1, b1, w2, b2, compute_dtype=jnp.float32)
    assert jnp.allclose(out, ref_f32, atol=atol_f32, rtol=5e-2), "mismatch vs f32 ref"
    return out


if __name__ == "__main__":
    key = jax.random.PRNGKey(0)
    k1, k2, k3, k4 = jax.random.split(key, 4)

    # Test 1: small shapes consistent with the module.
    batch, seq, model_dim, hidden_dim = 2, 8, 32, 64
    w1, b1, w2, b2 = _make_params(k1, model_dim, hidden_dim)
    x = jax.random.normal(k2, (batch, seq, model_dim), jnp.float32)
    _check(x, w1, b1, w2, b2, atol_f32=2e-2)

    # Test 2: exercises multiple row tiles, row padding and the hidden-dim
    # reduction axis (grid > 1 on the hidden axis).
    batch, seq, model_dim, hidden_dim = 3, 100, 256, 1024
    w1, b1, w2, b2 = _make_params(k3, model_dim, hidden_dim)
    x = jax.random.normal(k4, (batch, seq, model_dim), jnp.float32)
    _check(x, w1, b1, w2, b2, atol_f32=5e-2)

    print("KERNEL_OK")
</pallas_src>

<mosaic_0001>
module attributes {stable_mosaic.version = 11 : i64} {
  func.func @_ffn_kernel_acc_in_out(%arg0: i32, %arg1: i32, %arg2: memref<16x128xbf16, #tpu.memory_space<vmem>>, %arg3: memref<128x128xbf16, #tpu.memory_space<vmem>>, %arg4: memref<1x128xf32, #tpu.memory_space<vmem>>, %arg5: memref<128x128xbf16, #tpu.memory_space<vmem>>, %arg6: memref<1x128xf32, #tpu.memory_space<vmem>>, %arg7: memref<16x128xf32, #tpu.memory_space<vmem>>) attributes {dimension_semantics = [#tpu.dimension_semantics<parallel>, #tpu.dimension_semantics<arbitrary>], iteration_bounds = array<i64: 1, 1>, scalar_prefetch = 0 : i64, scratch_operands = 0 : i64, tpu.core_type = #tpu.core_type<tc>, window_params = [{transform_indices = @transform_0, window_bounds = array<i64: 16, 128>}, {transform_indices = @transform_1, window_bounds = array<i64: 128, 128>}, {transform_indices = @transform_2, window_bounds = array<i64: 1, 128>}, {transform_indices = @transform_3, window_bounds = array<i64: 128, 128>}, {pipeline_mode = #tpu.pipeline_mode<synchronous>, transform_indices = @transform_4, window_bounds = array<i64: 1, 128>}, {transform_indices = @transform_5, window_bounds = array<i64: 16, 128>}]} {
    %c0 = arith.constant 0 : index
    %c0_0 = arith.constant 0 : index
    %0 = vector.load %arg2[%c0, %c0_0] : memref<16x128xbf16, #tpu.memory_space<vmem>>, vector<16x128xbf16>
    %c0_1 = arith.constant 0 : index
    %c0_2 = arith.constant 0 : index
    %1 = vector.load %arg3[%c0_1, %c0_2] : memref<128x128xbf16, #tpu.memory_space<vmem>>, vector<128x128xbf16>
    %cst = arith.constant dense<0.000000e+00> : vector<16x128xf32>
    %2 = tpu.matmul %0, %1, %cst {dimension_numbers = #tpu.dot_dimension_numbers<[1], [0], [0], [1], [0, 0, 1, 1], [], []>} : vector<16x128xbf16>, vector<128x128xbf16>, vector<16x128xf32> -> vector<16x128xf32>
    %c0_3 = arith.constant 0 : index
    %c0_4 = arith.constant 0 : index
    %3 = vector.load %arg4[%c0_3, %c0_4] : memref<1x128xf32, #tpu.memory_space<vmem>>, vector<1x128xf32>
    %4 = vector.broadcast %3 : vector<1x128xf32> to vector<16x128xf32>
    %5 = arith.addf %2, %4 : vector<16x128xf32>
    %cst_5 = arith.constant 0.000000e+00 : f32
    %6 = vector.broadcast %cst_5 : f32 to vector<16x128xf32>
    %7 = arith.maximumf %5, %6 : vector<16x128xf32>
    %8 = arith.truncf %7 : vector<16x128xf32> to vector<16x128xbf16>
    %c0_6 = arith.constant 0 : index
    %c0_7 = arith.constant 0 : index
    %9 = vector.load %arg5[%c0_6, %c0_7] : memref<128x128xbf16, #tpu.memory_space<vmem>>, vector<128x128xbf16>
    %cst_8 = arith.constant dense<0.000000e+00> : vector<16x128xf32>
    %10 = tpu.matmul %8, %9, %cst_8 {dimension_numbers = #tpu.dot_dimension_numbers<[1], [0], [0], [1], [0, 0, 1, 1], [], []>} : vector<16x128xbf16>, vector<128x128xbf16>, vector<16x128xf32> -> vector<16x128xf32>
    %c0_i32 = arith.constant 0 : i32
    %11 = arith.cmpi eq, %arg1, %c0_i32 : i32
    %12 = arith.extui %11 : i1 to i32
    %c0_i32_9 = arith.constant 0 : i32
    %13 = arith.cmpi ne, %12, %c0_i32_9 : i32
    scf.if %13 {
      %c0_14 = arith.constant 0 : index
      %c0_15 = arith.constant 0 : index
      %20 = vector.load %arg7[%c0_14, %c0_15] : memref<16x128xf32, #tpu.memory_space<vmem>>, vector<16x128xf32>
      tpu.vector_store %arg7[%c0_14, %c0_15], %10 {strides = array<i32>} : memref<16x128xf32, #tpu.memory_space<vmem>>, vector<16x128xf32>,
    } else {
    }
    %c0_i32_10 = arith.constant 0 : i32
    %14 = arith.cmpi sgt, %arg1, %c0_i32_10 : i32
    %15 = arith.extui %14 : i1 to i32
    %c0_i32_11 = arith.constant 0 : i32
    %16 = arith.cmpi ne, %15, %c0_i32_11 : i32
    scf.if %16 {
      %c0_14 = arith.constant 0 : index
      %c0_15 = arith.constant 0 : index
      %20 = vector.load %arg7[%c0_14, %c0_15] : memref<16x128xf32, #tpu.memory_space<vmem>>, vector<16x128xf32>
      %21 = arith.addf %20, %10 : vector<16x128xf32>
      %c0_16 = arith.constant 0 : index
      %c0_17 = arith.constant 0 : index
      %22 = vector.load %arg7[%c0_16, %c0_17] : memref<16x128xf32, #tpu.memory_space<vmem>>, vector<16x128xf32>
      tpu.vector_store %arg7[%c0_16, %c0_17], %21 {strides = array<i32>} : memref<16x128xf32, #tpu.memory_space<vmem>>, vector<16x128xf32>,
    } else {
    }
    %c0_i32_12 = arith.constant 0 : i32
    %17 = arith.cmpi eq, %arg1, %c0_i32_12 : i32
    %18 = arith.extui %17 : i1 to i32
    %c0_i32_13 = arith.constant 0 : i32
    %19 = arith.cmpi ne, %18, %c0_i32_13 : i32
    scf.if %19 {
      %c0_14 = arith.constant 0 : index
      %c0_15 = arith.constant 0 : index
      %20 = vector.load %arg7[%c0_14, %c0_15] : memref<16x128xf32, #tpu.memory_space<vmem>>, vector<16x128xf32>
      %c0_16 = arith.constant 0 : index
      %c0_17 = arith.constant 0 : index
      %21 = vector.load %arg6[%c0_16, %c0_17] : memref<1x128xf32, #tpu.memory_space<vmem>>, vector<1x128xf32>
      %22 = vector.broadcast %21 : vector<1x128xf32> to vector<16x128xf32>
      %23 = arith.addf %20, %22 : vector<16x128xf32>
      %c0_18 = arith.constant 0 : index
      %c0_19 = arith.constant 0 : index
      %24 = vector.load %arg7[%c0_18, %c0_19] : memref<16x128xf32, #tpu.memory_space<vmem>>, vector<16x128xf32>
      tpu.vector_store %arg7[%c0_18, %c0_19], %23 {strides = array<i32>} : memref<16x128xf32, #tpu.memory_space<vmem>>, vector<16x128xf32>,
    } else {
    }
    return
  }
  func.func @transform_0(%arg0: i32, %arg1: i32) -> (i32, i32) {
    %c0_i32 = arith.constant 0 : i32
    %c0_i32_0 = arith.constant 0 : i32
    return %arg0, %c0_i32 : i32, i32
  }
  func.func @transform_1(%arg0: i32, %arg1: i32) -> (i32, i32) {
    %c0_i32 = arith.constant 0 : i32
    %c0_i32_0 = arith.constant 0 : i32
    return %c0_i32, %arg1 : i32, i32
  }
  func.func @transform_2(%arg0: i32, %arg1: i32) -> (i32, i32) {
    %c0_i32 = arith.constant 0 : i32
    %c0_i32_0 = arith.constant 0 : i32
    return %c0_i32, %arg1 : i32, i32
  }
  func.func @transform_3(%arg0: i32, %arg1: i32) -> (i32, i32) {
    %c0_i32 = arith.constant 0 : i32
    %c0_i32_0 = arith.constant 0 : i32
    return %arg1, %c0_i32 : i32, i32
  }
  func.func @transform_4(%arg0: i32, %arg1: i32) -> (i32, i32) {
    %c0_i32 = arith.constant 0 : i32
    %c0_i32_0 = arith.constant 0 : i32
    %c0_i32_1 = arith.constant 0 : i32
    return %c0_i32, %c0_i32_0 : i32, i32
  }
  func.func @transform_5(%arg0: i32, %arg1: i32) -> (i32, i32) {
    %c0_i32 = arith.constant 0 : i32
    %c0_i32_0 = arith.constant 0 : i32
    return %arg0, %c0_i32 : i32, i32
  }
}

</mosaic_0001>

<bundles_post_ra>
// kernel: tpu_custom_call.1
= control target key start
LH: loop header
LB: loop body
LE: loop exit
PB: predicated region body
PF: predicated region fallthrough
CT: control target
= control target key end

     0   :  { %10 = vsyncpa [#allocation3], 0  ;;  %s541_s0 = inlined_call_operand.hbm [shape: bf16[16,128], index: 0, kind: input, shape index: {}]   ;;  %s542_s1 = inlined_call_operand.hbm [shape: bf16[128,128], index: 1, kind: input, shape index: {}]   ;;  %s543_s2 = inlined_call_operand.vmem [shape: f32[1,128], index: 2, kind: input, shape index: {}]   ;;  %s544_s3 = inlined_call_operand.hbm [shape: bf16[128,128], index: 3, kind: input, shape index: {}]   ;;  %s545_s4 = inlined_call_operand.vmem [shape: f32[1,128], index: 4, kind: input, shape index: {}]   ;;  %s546_s5 = inlined_call_operand.hbm [shape: f32[16,128], index: 5, kind: output, shape index: {}]  }
   0x1   :  { %11 = vsyncpa [#allocation6], 0 }
   0x2   :  { %12 = vsyncpa [#allocation4], 0  ;;  %s30_s20 = sshll.u32 %s542_s1, 4  ;;  %s485_s21 = smov [#allocation5]   ;;  %s31_s20 = int_to_ptr.hbm [resolvable:$true] %s30_s20 }
   0x3   :  { %s32_s22 = sshll.u32 %s485_s21, 4  ;;  %s17_s25 = sshll.u32 %s541_s0, 4  ;;  %s33_s22 = int_to_ptr.vmem [resolvable:$true] %s32_s22  ;;  %s18_s25 = int_to_ptr.hbm [resolvable:$true] %s17_s25 }
   0x4   :  { %s486_s26 = smov 64   ;;  %s487_s27 = smov 4  }
   0x5   :  { %38 = dma.hbm_to_vmem [thread:$0]  %s31_s20, 1024, %s33_s22, [#allocation6], %s486_s26, %s486_s26, %s487_s27  }
   0x6   :  { %s488_s28 = smov [#allocation2]   ;;  %s45_s7 = sshll.u32 %s544_s3, 4  ;;  %s46_s7 = int_to_ptr.hbm [resolvable:$true] %s45_s7 }
   0x7   :  { %s19_s29 = sshll.u32 %s488_s28, 4  ;;  %s489_s1 = smov [#allocation7]   ;;  %s20_s29 = int_to_ptr.vmem [resolvable:$true] %s19_s29 }
   0x8   :  { %25 = dma.hbm_to_vmem [thread:$0]  %s18_s25, 128, %s20_s29, [#allocation3], %s486_s26, %s486_s26, %s487_s27  }
   0x9   :  { %s47_s8 = sshll.u32 %s489_s1, 4  ;;  %s48_s8 = int_to_ptr.vmem [resolvable:$true] %s47_s8 }
   0xa   :  { %53 = dma.hbm_to_vmem [thread:$0]  %s46_s7, 1024, %s48_s8, [#allocation6], %s486_s26, %s486_s26, %s487_s27  }
   0xb   :  { %479 = dma.done.wait [#allocation3], 128  }
   0xc   :  { %480 = vsyncadd [#allocation3], 4294967168 }
   0xd   :  { %481 = dma.done.wait [#allocation6], 2048  }
   0xe   :  { %482 = vsyncadd [#allocation6], 4294965248  ;;  %v364_v0 = vld [vmem:[#allocation5 + $0x38] sm:$0xff]  ;;  %v363_v1 = vld [vmem:[#allocation5 + $0x30] sm:$0xff]  ;;  %s490_s11 = smov [#allocation8]   ;;  %s491_s15 = smov 128  }
   0xf   :  { %144 = vmatpush.bf16.msra.mxu0 %v364_v0  ;;  %v372_v2 = vld [vmem:[#allocation7 + $0x38] sm:$0xff]  ;;  %v371_v3 = vld [vmem:[#allocation7 + $0x30] sm:$0xff]  ;;  %v362_v4 = vld [vmem:[#allocation5 + $0x28] sm:$0xff]  ;;  %s272_s12 = sshll.u32 %s490_s11, 4  ;;  %s492_s16 = smov 8   ;;  %s273_s12 = int_to_ptr.vmem [resolvable:$true] %s272_s12 }
  0x10   :  { %225 = vmatpush.bf16.msra.mxu1 %v372_v2  ;;  %v370_v5 = vld [vmem:[#allocation7 + $0x28] sm:$0xff]  ;;  %v361_v6 = vld [vmem:[#allocation5 + $0x20] sm:$0xff]  ;;  %v360_v8 = vld [vmem:[#allocation5 + $0x18] sm:$0xff] }
  0x11   :  { %v369_v7 = vld [vmem:[#allocation7 + $0x20] sm:$0xff]  ;;  %v359_v9 = vld [vmem:[#allocation5 + $0x10] sm:$0xff]  ;;  %v358_v10 = vld [vmem:[#allocation5 + $0x8] sm:$0xff] }
  0x12   :  { %v357_v11 = vld [vmem:[#allocation5] sm:$0xff]  ;;  %v356_v12 = vld [vmem:[#allocation2] sm:$0xff]  ;;  %v367_v14 = vld [vmem:[#allocation7 + $0x10] sm:$0xff] }
  0x13   :  { %145 = vmatpush.bf16.msra.mxu0 %v363_v1  ;;  %v368_v13 = vld [vmem:[#allocation7 + $0x18] sm:$0xff]  ;;  %v366_v15 = vld [vmem:[#allocation7 + $0x8] sm:$0xff]  ;;  %v365_v16 = vld [vmem:[#allocation7] sm:$0xff] }
  0x14   :  { %226 = vmatpush.bf16.msra.mxu1 %v371_v3  ;;  %v381_v18 = vld [vmem:[%s543_s2] ss:$0 sm:$0xff]  ;;  %s274_s2 = sshll.u32 %s546_s5, 4  ;;  %s275_s2 = int_to_ptr.hbm [resolvable:$true] %s274_s2 }
  0x15   :  { %v382_v25 = vld [vmem:[%s545_s4] ss:$0 sm:$0xff] }
  0x17   :  { %146 = vmatpush.bf16.msra.mxu0 %v362_v4 }
  0x18   :  { %227 = vmatpush.bf16.msra.mxu1 %v370_v5 }
  0x1b   :  { %147 = vmatpush.bf16.msra.mxu0 %v361_v6 }
  0x1c   :  { %228 = vmatpush.bf16.msra.mxu1 %v369_v7 }
  0x1f   :  { %148 = vmatpush.bf16.msra.mxu0 %v360_v8 }
  0x20   :  { %229 = vmatpush.bf16.msra.mxu1 %v368_v13 }
  0x23   :  { %149 = vmatpush.bf16.msra.mxu0 %v359_v9 }
  0x24   :  { %230 = vmatpush.bf16.msra.mxu1 %v367_v14 }
  0x27   :  { %150 = vmatpush.bf16.msra.mxu0 %v358_v10 }
  0x28   :  { %231 = vmatpush.bf16.msra.mxu1 %v366_v15 }
  0x2b   :  { %151 = vmatpush.bf16.msra.mxu0 %v357_v11 }
  0x2c   :  { %232 = vmatpush.bf16.msra.mxu1 %v365_v16 }
  0x2e   :  { %152 = vmatmul.bf16.vlgmr.msra.gmra.mxu0 %v356_v12 }
  0xab   :  { %v153_v17 = vpop.f32.mrf.mxu0 }
  0xac   :  { %v154_v19 = vadd.f32 %v381_v18, %v153_v17 }
  0xae   :  { %v158_v22 = vmax.f32 %v154_v19, 0.0 }
  0xb3   :  { %v155_v20 = vpop.f32.mrf.mxu0 }
  0xb4   :  { %v156_v21 = vadd.f32 %v381_v18, %v155_v20 }
  0xb6   :  { %v159_v23 = vmax.f32 %v156_v21, 0.0 }
  0xb8   :  { %v160_v24 = vpack.c.bf16 %v159_v23, %v158_v22 }
  0xba   :  { %233 = vmatmul.bf16.vlgmr.msra.gmra.mxu1 %v160_v24 }
 0x137   :  { %v234_v26 = vpop.f32.mrf.mxu1 }
 0x138   :  { %v264_v27 = vadd.f32 %v382_v25, %v234_v26 }
 0x13a   :  { %266 = vst [vmem:[#allocation8] sm:$0xff] %v264_v27 }
 0x13f   :  { %v236_v28 = vpop.f32.mrf.mxu1 }
 0x140   :  { %v265_v29 = vadd.f32 %v382_v25, %v236_v28 }
 0x142   :  { %267 = vst [vmem:[#allocation8 + $0x8] sm:$0xff] %v265_v29 }
 0x143   :  { %280 = dma.vmem_to_hbm [thread:$0]  %s273_s12, 256, %s275_s2, [#allocation4], %s491_s15, %s491_s15, %s492_s16  }
 0x144   :  { %483 = dma.done.wait [#allocation4], 256  }
 0x145   :  { %484 = vsyncadd [#allocation4], 4294967040 }
 0x146   :  { %285 = vsyncpa [#allocation3], 1 }
 0x147   :  { %286 = vsyncpa [#allocation6], 1 }
 0x148   :  { %287 = vsyncpa [#allocation4], 1 }

</bundles_post_ra>
